<compile_context>
chip_gen: v6e
topology: v6e:2x2x1
jax: 0.10.0
libtpu: 0.0.40
codegen_flags: <defaults>
</compile_context>

<pallas_src>
import jax
import jax.numpy as jnp
from jax.experimental import pallas as pl
from jax.experimental.pallas import tpu as pltpu


def _uncertainty_loss_kernel(lv_ref, ls_ref, out_ref):
    # lv_ref: (1, N) float32 in VMEM — log_vars (the nn.Parameter).
    # ls_ref: (1, N) float32 in VMEM — per-task scalar losses.
    # out_ref: (1, 1) float32 in SMEM — scalar result.
    lv = lv_ref[...]                          # (1, N)
    ls = ls_ref[...]                          # (1, N)
    weighted = jnp.exp(-lv) * ls + lv         # EUP exp + VPU mul/add
    out_ref[0, 0] = jnp.sum(weighted)         # XLU lane reduce -> scalar -> SMEM store


@jax.jit
def uncertainty_loss(log_vars: jax.Array, losses: jax.Array) -> jax.Array:
    """Pallas TPU implementation of UncertaintyLoss.forward.

    Args:
      log_vars: (num_tasks,) float32 parameter (PyTorch: nn.Parameter(zeros)).
      losses:   (num_tasks,) float32 per-task scalar losses.

    Returns:
      scalar float32 total loss.
    """
    num_tasks = log_vars.shape[0]
    assert losses.shape == (num_tasks,)

    # Two tiny (1, N) inputs -> two back-to-back prologue DMAs; no extra XLA stack op.
    lv2d = log_vars.astype(jnp.float32).reshape(1, num_tasks)
    ls2d = losses.astype(jnp.float32).reshape(1, num_tasks)

    out = pl.pallas_call(
        _uncertainty_loss_kernel,
        out_shape=jax.ShapeDtypeStruct((1, 1), jnp.float32),
        in_specs=[
            # Untiled full-array blocks resident in VMEM (no grid, no index_map).
            pl.BlockSpec(memory_space=pltpu.VMEM),
            pl.BlockSpec(memory_space=pltpu.VMEM),
        ],
        # Scalar output lives in SMEM: avoids masked vector store + padded tile writeback.
        out_specs=pl.BlockSpec(memory_space=pltpu.SMEM),
        # Advisory cost hint: ~3 flops + 1 transcendental per task; 2*4*N bytes in, 4 out.
        cost_estimate=pl.CostEstimate(
            flops=3 * num_tasks,
            transcendentals=num_tasks,
            bytes_accessed=8 * num_tasks + 4,
        ),
    )(lv2d, ls2d)
    return out[0, 0]


if __name__ == "__main__":
    num_tasks = 2

    # Deterministic parameter init, matching nn.Parameter(torch.zeros(num_tasks)).
    log_vars = jnp.zeros((num_tasks,), dtype=jnp.float32)

    # Deterministic example per-task losses (scalars), as the module's forward expects.
    key = jax.random.PRNGKey(0)
    losses = jax.random.uniform(
        key, (num_tasks,), dtype=jnp.float32, minval=0.0, maxval=2.0
    )

    total = uncertainty_loss(log_vars, losses)
    total = jax.block_until_ready(total)

    # Pure-JAX reference check (same math as the PyTorch loop).
    ref = jnp.sum(jnp.exp(-log_vars) * losses + log_vars)
    assert jnp.allclose(total, ref, rtol=1e-6, atol=1e-6), (total, ref)

    print("KERNEL_OK")
</pallas_src>

<mosaic_0001>
module attributes {stable_mosaic.version = 11 : i64} {
  func.func @_uncertainty_loss_kernel(%arg0: memref<1x2xf32, #tpu.memory_space<vmem>>, %arg1: memref<1x2xf32, #tpu.memory_space<vmem>>, %arg2: memref<1x1xf32, #tpu.memory_space<smem>>) attributes {dimension_semantics = [], scalar_prefetch = 0 : i64, scratch_operands = 0 : i64, tpu.core_type = #tpu.core_type<tc>} {
    %c0 = arith.constant 0 : index
    %c0_0 = arith.constant 0 : index
    %0 = vector.load %arg0[%c0, %c0_0] : memref<1x2xf32, #tpu.memory_space<vmem>>, vector<1x2xf32>
    %c0_1 = arith.constant 0 : index
    %c0_2 = arith.constant 0 : index
    %1 = vector.load %arg1[%c0_1, %c0_2] : memref<1x2xf32, #tpu.memory_space<vmem>>, vector<1x2xf32>
    %cst = arith.constant 0.000000e+00 : f32
    %2 = vector.broadcast %cst : f32 to vector<1x2xf32>
    %3 = arith.subf %2, %0 : vector<1x2xf32>
    %4 = math.exp %3 : vector<1x2xf32>
    %5 = arith.mulf %4, %1 : vector<1x2xf32>
    %6 = arith.addf %5, %0 : vector<1x2xf32>
    %7 = vector.shape_cast %6 : vector<1x2xf32> to vector<1x1x2xf32>
    %cst_3 = arith.constant dense<0.000000e+00> : vector<1xf32>
    %8 = vector.multi_reduction <add>, %7, %cst_3 [1, 2] : vector<1x1x2xf32> to vector<1xf32>
    %9 = vector.shape_cast %8 : vector<1xf32> to vector<1x1x1xf32>
    %10 = vector.extract %9[0, 0, 0] : f32 from vector<1x1x1xf32>
    %c0_4 = arith.constant 0 : index
    %c0_5 = arith.constant 0 : index
    %11 = memref.load %arg2[%c0_4, %c0_5] : memref<1x1xf32, #tpu.memory_space<smem>>
    memref.store %10, %arg2[%c0_4, %c0_5] : memref<1x1xf32, #tpu.memory_space<smem>>
    return
  }
}

</mosaic_0001>

<bundles_post_ra>
// kernel: uncertainty_loss.1
= control target key start
LH: loop header
LB: loop body
LE: loop exit
PB: predicated region body
PF: predicated region fallthrough
CT: control target
= control target key end

     0   :  { %s85_s0 = inlined_call_operand.vmem [shape: f32[1,2], index: 0, kind: input, shape index: {}]   ;;  %s86_s1 = inlined_call_operand.vmem [shape: f32[1,2], index: 1, kind: input, shape index: {}]   ;;  %s87_s2 = inlined_call_operand.hbm [shape: f32[1,1], index: 2, kind: output, shape index: {}]  }
   0x1   :  { %v12_v0 = vld [vmem:[%s85_s0] sm:$0x1] }
   0x2   :  { %v14_v1 = vsub.f32 0.0, %v12_v0 }
   0x3   :  { %7 = vsyncpa [#allocation3], 0  ;;  %v13_v3 = vld [vmem:[%s86_s1] sm:$0x1]  ;;  %vm19_vm0 = vcmask 8192   ;;  %s60_s13 = smov [#allocation2]  }
   0x4   :  { %v15_v2 = vmul.f32 1.442695, %v14_v1 }
   0x6   :  { %48 = vpow2.f32 %v15_v2 }
  0x13   :  { %v49_v4 = vpop.eup %48 }
  0x14   :  { %v17_v5 = vmul.f32 %v49_v4, %v13_v3 }
  0x16   :  { %v18_v6 = vadd.f32 %v17_v5, %v12_v0 }
  0x18   :  { %v20_v7 = vsel %vm19_vm0, %v18_v6, 0.0 }
  0x19   :  { %21 = vadd.xlane.f32.xlu0 %v20_v7 }
  0xa2   :  { %v22_v8 = vpop.xlane.xlu0 %21 }
  0xa3   :  { %v23_v9 = vrot.slane %v22_v8, 4 }
  0xa5   :  { %v24_v10 = vadd.f32 %v23_v9, %v22_v8 }
  0xa7   :  { %v25_v11 = vrot.slane %v24_v10, 2 }
  0xa9   :  { %v26_v12 = vadd.f32 %v25_v11, %v24_v10 }
  0xab   :  { %v27_v13 = vrot.slane %v26_v12, 1 }
  0xad   :  { %v28_v14 = vadd.f32 %v27_v13, %v26_v12 }
  0xaf   :  { %45 = vpush %v28_v14 }
  0xe0   :  { %s46_s0 = spop %45 }
  0xe1   :  { %31 = sst [smem:[#allocation2]] %s46_s0 }
  0xe2   :  { %39 = dma.smem_to_hbm %s60_s13, 16, %s87_s2, [#allocation3]  }
  0xe3   :  { %58 = dma.done.wait [#allocation3], 16  }
  0xe4   :  { %59 = vsyncadd [#allocation3], 4294967280 }
  0xe5   :  { %43 = sfence }
  0xe6   :  { %44 = vsyncpa [#allocation3], 1 }

</bundles_post_ra>
